<compile_context>
chip_gen: v7x
topology: tpu7x:2x2x1
jax: 0.10.0
libtpu: 0.0.40
codegen_flags: <defaults>
</compile_context>

<pallas_src>
import numpy as np
import jax
import jax.numpy as jnp
from jax.experimental import pallas as pl
from jax.experimental.pallas import tpu as pltpu

DIM_OPTIONS = (8, 16, 32, 64, 128)   # PyTorch module defaults


def mixed_latent_kernel(x_ref, w_ref, b_ref, out_ref):
    """One lane-dense MXU matmul per row block.

    x_ref:   VMEM (blk, F) bf16  input row block (streamed)
    w_ref:   VMEM (F, D)   bf16  softmax-folded weight (grid-invariant, single-buffered)
    b_ref:   VMEM (1, D)   f32   softmax-folded bias   (grid-invariant, single-buffered)
    out_ref: VMEM (blk, D) f32   D = max(dim_options) = 128 (lane-dense stores)
    """
    acc = jnp.dot(x_ref[...], w_ref[...], preferred_element_type=jnp.float32)
    out_ref[...] = acc + b_ref[...]          # bias add kept in f32 (no bf16 VPU on v5e)


def init_params(key, in_features):
    """PyTorch-style init: Linear weight/bias ~ U(-1/sqrt(fan_in), 1/sqrt(fan_in)); arch ~ N(0,1)."""
    n = len(DIM_OPTIONS)
    ks = jax.random.split(key, 2 * n + 1)
    bound = 1.0 / np.sqrt(in_features)
    weights, biases = [], []
    for i, d in enumerate(DIM_OPTIONS):
        weights.append(jax.random.uniform(ks[2 * i], (d, in_features), jnp.float32, -bound, bound))
        biases.append(jax.random.uniform(ks[2 * i + 1], (d,), jnp.float32, -bound, bound))
    alpha = jax.random.normal(ks[-1], (n,), jnp.float32)
    return {"weights": weights, "biases": biases, "alpha": alpha}


def pack_params(p):
    """One-time preprocessing: transpose each Linear weight to (in, out), zero-pad the output dim
    to max_dim (zero columns reproduce torch.cat([out, zeros], dim=1)), and stack candidates."""
    in_features = p["weights"][0].shape[1]
    D = max(DIM_OPTIONS)
    n = len(DIM_OPTIONS)
    w_stk = np.zeros((n, in_features, D), np.float32)
    b_stk = np.zeros((n, D), np.float32)
    for i, d in enumerate(DIM_OPTIONS):
        w_stk[i, :, :d] = np.asarray(p["weights"][i]).T
        b_stk[i, :d] = np.asarray(p["biases"][i])
    return jnp.asarray(w_stk), jnp.asarray(b_stk)


def _round_up(v, m):
    return -(-v // m) * m


def mixed_latent_forward(x, alpha, w_stk, b_stk, *, block_rows=1024):
    """x: (B, in_features) -> (B, max_dim)."""
    B, F = x.shape
    n_ops, _, D = w_stk.shape

    # --- Wrapper-side glue (grid-invariant, executed once per forward) -----------------------
    # Fold softmax(arch weights) into ONE weight/bias instead of re-folding every grid step.
    arch_w = jax.nn.softmax(alpha)                               # tiny 5-element softmax
    w_fold = jnp.einsum("n,nfd->fd", arch_w, w_stk)              # (F, D) f32
    b_fold = jnp.einsum("n,nd->d", arch_w, b_stk)[None, :]       # (1, D) f32 (stays f32)

    # HBM-bound kernel: stream matmul operands in bf16, accumulate in f32 on the MXU.
    x_bf = x.astype(jnp.bfloat16)
    w_bf = w_fold.astype(jnp.bfloat16)

    # --- Row-block sizing (8-row sublane rule; minimize padded-tail waste) --------------------
    block_rows = _round_up(block_rows, 8)
    if B <= block_rows:
        blk = _round_up(B, 8)                                    # single block, pad < 8 rows
    else:
        n_blocks = -(-B // block_rows)
        blk = _round_up(-(-B // n_blocks), 8)                    # near-even split across blocks
    B_pad = _round_up(B, blk)
    if B_pad != B:
        x_bf = jnp.pad(x_bf, ((0, B_pad - B), (0, 0)))           # zero rows, sliced off below

    # --- Explicit VMEM budget (tight on v7x 64 MiB phys / 32 MiB scoped, v5e 16 MiB scoped) ---
    vmem_bytes = (2 * blk * F * 2       # x bf16, double-buffered
                  + 1 * F * D * 2       # folded weight bf16, single-buffered
                  + 1 * 1 * D * 4       # folded bias f32, single-buffered
                  + 2 * blk * D * 4)    # output f32, double-buffered
    vmem_limit = int(min(max(2 * vmem_bytes + (1 << 20), 16 << 20), 64 << 20))

    out = pl.pallas_call(
        mixed_latent_kernel,
        out_shape=jax.ShapeDtypeStruct((B_pad, D), jnp.float32),
        grid=(B_pad // blk,),
        in_specs=[
            pl.BlockSpec((blk, F), lambda i: (i, 0)),                                  # x rows
            pl.BlockSpec((F, D), lambda i: (0, 0), pipeline_mode=pl.Buffered(1)),      # weight
            pl.BlockSpec((1, D), lambda i: (0, 0), pipeline_mode=pl.Buffered(1)),      # bias
        ],
        out_specs=pl.BlockSpec((blk, D), lambda i: (i, 0)),                            # lane-dense
        compiler_params=pltpu.CompilerParams(
            dimension_semantics=("parallel",),          # independent row blocks -> megacore/v7x
            vmem_limit_bytes=vmem_limit),
    )(x_bf, w_bf, b_fold)
    return out[:B]


def ref_forward(x, p):
    """Pure-JAX reference mirroring the PyTorch forward literally (f32, HIGHEST precision)."""
    w = jax.nn.softmax(p["alpha"])
    D = max(DIM_OPTIONS)
    out = jnp.zeros((x.shape[0], D), jnp.float32)
    for i, d in enumerate(DIM_OPTIONS):
        y = jnp.dot(x, p["weights"][i].T,
                    precision=jax.lax.Precision.HIGHEST) + p["biases"][i]
        y = jnp.pad(y, ((0, 0), (0, D - d)))             # torch.cat([out, zeros], dim=1)
        out = out + w[i] * y
    return out


if __name__ == "__main__":
    key = jax.random.PRNGKey(0)
    kx, kp = jax.random.split(key)

    B, in_features = 16, 32
    x = jax.random.normal(kx, (B, in_features), jnp.float32)
    params = init_params(kp, in_features)
    w_stk, b_stk = pack_params(params)

    out = jax.block_until_ready(mixed_latent_forward(x, params["alpha"], w_stk, b_stk))
    ref = jax.block_until_ready(ref_forward(x, params))

    # Kernel streams bf16 operands with f32 accumulation; reference is near-exact f32,
    # hence the 2e-2 tolerance (same as the original default-MXU-precision version).
    np.testing.assert_allclose(np.asarray(out), np.asarray(ref), rtol=2e-2, atol=2e-2)
    assert out.shape == (B, max(DIM_OPTIONS))
    print("KERNEL_OK")
</pallas_src>

<mosaic_0001>
module attributes {stable_mosaic.version = 11 : i64} {
  func.func @mixed_latent_kernel(%arg0: i32, %arg1: memref<16x32xbf16, #tpu.memory_space<vmem>>, %arg2: memref<32x128xbf16, #tpu.memory_space<vmem>>, %arg3: memref<1x128xf32, #tpu.memory_space<vmem>>, %arg4: memref<16x128xf32, #tpu.memory_space<vmem>>) attributes {dimension_semantics = [#tpu.dimension_semantics<parallel>], iteration_bounds = array<i64: 1>, scalar_prefetch = 0 : i64, scratch_operands = 0 : i64, tpu.core_type = #tpu.core_type<tc>, window_params = [{transform_indices = @transform_0, window_bounds = array<i64: 16, 32>}, {pipeline_mode = #tpu.pipeline_mode<synchronous>, transform_indices = @transform_1, window_bounds = array<i64: 32, 128>}, {pipeline_mode = #tpu.pipeline_mode<synchronous>, transform_indices = @transform_2, window_bounds = array<i64: 1, 128>}, {transform_indices = @transform_3, window_bounds = array<i64: 16, 128>}]} {
    %c0 = arith.constant 0 : index
    %c0_0 = arith.constant 0 : index
    %0 = vector.load %arg1[%c0, %c0_0] : memref<16x32xbf16, #tpu.memory_space<vmem>>, vector<16x32xbf16>
    %c0_1 = arith.constant 0 : index
    %c0_2 = arith.constant 0 : index
    %1 = vector.load %arg2[%c0_1, %c0_2] : memref<32x128xbf16, #tpu.memory_space<vmem>>, vector<32x128xbf16>
    %cst = arith.constant dense<0.000000e+00> : vector<16x128xf32>
    %2 = tpu.matmul %0, %1, %cst {dimension_numbers = #tpu.dot_dimension_numbers<[1], [0], [0], [1], [0, 0, 1, 1], [], []>} : vector<16x32xbf16>, vector<32x128xbf16>, vector<16x128xf32> -> vector<16x128xf32>
    %c0_3 = arith.constant 0 : index
    %c0_4 = arith.constant 0 : index
    %3 = vector.load %arg3[%c0_3, %c0_4] : memref<1x128xf32, #tpu.memory_space<vmem>>, vector<1x128xf32>
    %4 = vector.broadcast %3 : vector<1x128xf32> to vector<16x128xf32>
    %5 = arith.addf %2, %4 : vector<16x128xf32>
    %c0_5 = arith.constant 0 : index
    %c0_6 = arith.constant 0 : index
    %6 = vector.load %arg4[%c0_5, %c0_6] : memref<16x128xf32, #tpu.memory_space<vmem>>, vector<16x128xf32>
    tpu.vector_store %arg4[%c0_5, %c0_6], %5 {strides = array<i32>} : memref<16x128xf32, #tpu.memory_space<vmem>>, vector<16x128xf32>,
    return
  }
  func.func @transform_0(%arg0: i32) -> (i32, i32) {
    %c0_i32 = arith.constant 0 : i32
    %c0_i32_0 = arith.constant 0 : i32
    return %arg0, %c0_i32 : i32, i32
  }
  func.func @transform_1(%arg0: i32) -> (i32, i32) {
    %c0_i32 = arith.constant 0 : i32
    %c0_i32_0 = arith.constant 0 : i32
    %c0_i32_1 = arith.constant 0 : i32
    return %c0_i32, %c0_i32_0 : i32, i32
  }
  func.func @transform_2(%arg0: i32) -> (i32, i32) {
    %c0_i32 = arith.constant 0 : i32
    %c0_i32_0 = arith.constant 0 : i32
    %c0_i32_1 = arith.constant 0 : i32
    return %c0_i32, %c0_i32_0 : i32, i32
  }
  func.func @transform_3(%arg0: i32) -> (i32, i32) {
    %c0_i32 = arith.constant 0 : i32
    %c0_i32_0 = arith.constant 0 : i32
    return %arg0, %c0_i32 : i32, i32
  }
}

</mosaic_0001>

<bundles_post_ra>
// kernel: tpu_custom_call.1
= control target key start
LH: loop header
LB: loop body
LE: loop exit
PB: predicated region body
PF: predicated region fallthrough
CT: control target
= control target key end

     0   :  { %8 = vsyncpa [#allocation3], 0  ;;  %s307_s0 = inlined_call_operand.hbm [shape: bf16[16,32], index: 0, kind: input, shape index: {}]   ;;  %s308_s1 = inlined_call_operand.hbm [shape: bf16[32,128], index: 1, kind: input, shape index: {}]   ;;  %s309_s2 = inlined_call_operand.vmem [shape: f32[1,128], index: 2, kind: input, shape index: {}]   ;;  %s310_s3 = inlined_call_operand.hbm [shape: f32[16,128], index: 3, kind: output, shape index: {}]  }
   0x1   :  { %9 = vsyncpa [#allocation6], 0 }
   0x2   :  { %10 = vsyncpa [#allocation4], 0  ;;  %s239_s12 = smov [#allocation2]   ;;  %s167_s16 = scalar_lea.hbm %s307_s0, 128 }
   0x3   :  { %s16_s13 = sshll.u32 %s239_s12, 4  ;;  %p168_p0 = scmp.ne.s32.totalorder %s307_s0, %s167_s16  ;;  %s17_s13 = int_to_ptr.vmem [resolvable:$true] %s16_s13 }
   0x4   :  { %p171_p1 = scmp.lt.u32.totalorder %s167_s16, %s307_s0 }
   0x6   :  { %p173_p2 = pnand %p171_p1, %p168_p0 }
   0x8   :  { %176 = shalt.err (!%p173_p2)
}
   0x9   :  { %s177_s21 = scalar_lea.vmem %s17_s13, 128  ;;  %p182_p4 = scmp.lt.s32.totalorder %s17_s13, %s17_s13 }
   0xa   :  { %p178_p3 = scmp.ne.s32.totalorder %s17_s13, %s177_s21  ;;  %p183_p5 = scmp.lt.s32.totalorder %s177_s21, %s177_s21 }
   0xc   :  { %p184_p6 = por %p183_p5, %p182_p4 }
   0xe   :  { %p185_p7 = pnand %p184_p6, %p178_p3 }
  0x10   :  { %188 = shalt.err (!%p185_p7)
}
  0x11   :  { %s240_s22 = smov 64   ;;  %s241_s23 = smov 4  }
  0x12   :  { %22 = dma.hbm_to_vmem [thread:$0]  %s307_s0, 128, %s17_s13, [#allocation3], %s240_s22, %s240_s22, %s241_s23  }
  0x13   :  { %s242_s26 = smov [#allocation5]   ;;  %s189_s30 = scalar_lea.hbm %s308_s1, 256 }
  0x14   :  { %s28_s27 = sshll.u32 %s242_s26, 4  ;;  %p190_p8 = scmp.ne.s32.totalorder %s308_s1, %s189_s30  ;;  %s29_s27 = int_to_ptr.vmem [resolvable:$true] %s28_s27 }
  0x15   :  { %p193_p9 = scmp.lt.u32.totalorder %s189_s30, %s308_s1 }
  0x17   :  { %p195_p10 = pnand %p193_p9, %p190_p8 }
  0x19   :  { %198 = shalt.err (!%p195_p10)
}
  0x1a   :  { %s199_s8 = scalar_lea.vmem %s29_s27, 256  ;;  %p204_p12 = scmp.lt.s32.totalorder %s29_s27, %s29_s27 }
  0x1b   :  { %p200_p11 = scmp.ne.s32.totalorder %s29_s27, %s199_s8  ;;  %p205_p13 = scmp.lt.s32.totalorder %s199_s8, %s199_s8 }
  0x1d   :  { %p206_p0 = por %p205_p13, %p204_p12 }
  0x1f   :  { %p207_p1 = pnand %p206_p0, %p200_p11 }
  0x21   :  { %210 = shalt.err (!%p207_p1)
}
  0x22   :  { %34 = dma.hbm_to_vmem [thread:$0]  %s308_s1, 256, %s29_s27, [#allocation6], %s240_s22, %s240_s22, %s241_s23  }
  0x23   :  { %233 = dma.done.wait [#allocation3], 128  }
  0x24   :  { %234 = vsyncadd [#allocation3], 4294967168 }
  0x25   :  { %235 = dma.done.wait [#allocation6], 256  }
  0x26   :  { %236 = vsyncadd [#allocation6], 4294967040  ;;  %v243_v0 = vmov 0.0   ;;  %vm244_vm0 = vmmov 0   ;;  %v164_v1 = vld [vmem:[#allocation5] sm:$0xff]   ;;  %v165_v2 = vld [vmem:[#allocation5 + $0x8] sm:$0xff]  }
  0x27   :  { %147 = vmatprep.subr.bf16.mxu0 %v243_v0  ;;  %151 = vmatprep.mubr.msk.bf16.mxu0 %vm244_vm0, %v243_v0  ;;  %v166_v3 = vld [vmem:[#allocation2] sm:$0xff]   ;;  %vm74_vm1 = vcmask 261120   ;;  %s245_s1 = smov [#allocation7]  }
  0x28   :  { %148 = vmatpush3.bf16.msra.mxu0 %v164_v1  ;;  %v139_v4 = vld [vmem:[%s309_s2] ss:$0 sm:$0xff]  ;;  %s126_s12 = sshll.u32 %s245_s1, 4  ;;  %s127_s12 = int_to_ptr.vmem [resolvable:$true] %s126_s12 }
  0x29   :  { %149 = vmatprep.subr.bf16.mxu0 %v243_v0  ;;  %s211_s13 = scalar_lea.vmem %s127_s12, 256  ;;  %p216_p3 = scmp.lt.s32.totalorder %s127_s12, %s127_s12 }
  0x2a   :  { %p212_p2 = scmp.ne.s32.totalorder %s127_s12, %s211_s13  ;;  %p217_p4 = scmp.lt.s32.totalorder %s211_s13, %s211_s13 }
  0x2c   :  { %150 = vmatpush3.bf16.msra.mxu0 %v165_v2  ;;  %p218_p5 = por %p217_p4, %p216_p3 }
  0x2e   :  { %p219_p6 = pnand %p218_p5, %p212_p2 }
  0x2f   :  { %152 = vmatmul.mubr.msk.bf16.vlgmr.msra.gmra.mrb[0].mxu0 %vm74_vm1, %v166_v3 }
 0x102   :  { %v112_v5 = vpop.f32.mrb[0].mxu0 }
 0x103   :  { %v113_v6 = vadd.f32 %v139_v4, %v112_v5  ;;  %v153_v7 = vpop.f32.mrb[1].mxu0 }
 0x104   :  { %v115_v8 = vpop.f32.mrb[2].mxu0 }
 0x105   :  { %119 = vst [vmem:[#allocation7] sm:$0xff] %v113_v6  ;;  %v116_v9 = vadd.f32 %v139_v4, %v115_v8  ;;  %v154_v10 = vpop.f32.mrb[3].mxu0 }
 0x107   :  { %120 = vst [vmem:[#allocation7 + $0x8] sm:$0xff] %v116_v9 }
 0x108   :  { %222 = shalt.err (!%p219_p6)
}
 0x109   :  { %s223_s15 = scalar_lea.hbm %s310_s3, 256 }
 0x10a   :  { %p224_p7 = scmp.ne.s32.totalorder %s310_s3, %s223_s15  ;;  %p227_p8 = scmp.lt.u32.totalorder %s223_s15, %s310_s3 }
 0x10c   :  { %p229_p9 = pnand %p227_p8, %p224_p7 }
 0x10e   :  { %232 = shalt.err (!%p229_p9)
}
 0x10f   :  { %s246_s20 = smov 128   ;;  %s247_s21 = smov 8  }
 0x110   :  { %132 = dma.vmem_to_hbm [thread:$0]  %s127_s12, 256, %s310_s3, [#allocation4], %s246_s20, %s246_s20, %s247_s21  }
 0x111   :  { %237 = dma.done.wait [#allocation4], 256  }
 0x112   :  { %238 = vsyncadd [#allocation4], 4294967040 }
 0x113   :  { %136 = vsyncpa [#allocation3], 1 }
 0x114   :  { %137 = vsyncpa [#allocation6], 1 }
 0x115   :  { %138 = vsyncpa [#allocation4], 1 }

</bundles_post_ra>
